<compile_context>
chip_gen: v6e
topology: v6e:2x2x1
jax: 0.10.0
libtpu: 0.0.40
codegen_flags: <defaults>
</compile_context>

<pallas_src>
import math
import functools

import jax
import jax.numpy as jnp
from jax.experimental import pallas as pl
from jax.experimental.pallas import tpu as pltpu


def _layer_norm(x, gamma, beta, eps=1e-5):
    # PyTorch LayerNorm (biased variance), two-pass form for numerical safety.
    mean = jnp.mean(x, axis=-1, keepdims=True)
    cent = x - mean
    var = jnp.mean(cent * cent, axis=-1, keepdims=True)
    return cent * jax.lax.rsqrt(var + eps) * gamma + beta


def _vmem_limit_bytes():
    # ~56 MiB on v7x (64 MiB VMEM), ~120 MiB on v5e/v6e (128 MiB VMEM).
    try:
        cap = pltpu.get_tpu_info().vmem_capacity_bytes
    except Exception:
        cap = 64 * 1024 * 1024
    return int(cap - 8 * 1024 * 1024)


# ---------------------------------------------------------------------------
# Kernel 1: fused QKV projection, head-major bf16 outputs, Q scaled by 1/sqrt(dh)
# ---------------------------------------------------------------------------
def qkv_proj_kernel(x_ref, wqkv_ref, bqkv_ref, q_ref, k_ref, v_ref,
                    *, num_heads, scale):
    ts, D = x_ref.shape[1], x_ref.shape[2]
    H = num_heads
    dh = D // H

    x = x_ref[0].astype(jnp.bfloat16)                               # (ts, D)
    qkv = jnp.dot(x, wqkv_ref[...],
                  preferred_element_type=jnp.float32) + bqkv_ref[...]   # (ts, 3D) f32

    q = qkv[:, :D] * scale                                          # fold 1/sqrt(dh)
    k = qkv[:, D:2 * D]
    v = qkv[:, 2 * D:]

    def to_heads(t):                                                # (ts, D) -> (H, ts, dh)
        return jnp.swapaxes(t.reshape(ts, H, dh), 0, 1)

    q_ref[0] = to_heads(q).astype(q_ref.dtype)
    k_ref[0] = to_heads(k).astype(k_ref.dtype)
    v_ref[0] = to_heads(v).astype(v_ref.dtype)


# ---------------------------------------------------------------------------
# Kernel 2: flash-style attention over KV tiles (online softmax), bf16 matmuls
# ---------------------------------------------------------------------------
def flash_attn_kernel(q_ref, k_ref, v_ref, o_ref, m_sc, l_sc, acc_sc):
    ki = pl.program_id(2)

    @pl.when(ki == 0)
    def _():
        m_sc[...] = jnp.full_like(m_sc, -jnp.inf)
        l_sc[...] = jnp.zeros_like(l_sc)
        acc_sc[...] = jnp.zeros_like(acc_sc)

    q = q_ref[0]                                                    # (H, tq, dh) bf16
    k = k_ref[0]                                                    # (H, tkv, dh) bf16
    v = v_ref[0]                                                    # (H, tkv, dh) bf16

    s = jnp.einsum('hqd,hkd->hqk', q, k,
                   preferred_element_type=jnp.float32)              # (H, tq, tkv) f32
    m_prev = m_sc[...]
    m_new = jnp.maximum(m_prev, s.max(axis=-1, keepdims=True))
    alpha = jnp.exp(m_prev - m_new)
    p = jnp.exp(s - m_new)
    l_sc[...] = alpha * l_sc[...] + p.sum(axis=-1, keepdims=True)
    acc_sc[...] = alpha * acc_sc[...] + jnp.einsum(
        'hqk,hkd->hqd', p.astype(v.dtype), v,
        preferred_element_type=jnp.float32)
    m_sc[...] = m_new

    @pl.when(ki == pl.num_programs(2) - 1)
    def _():
        H, tq, dh = acc_sc.shape
        attn = acc_sc[...] * pl.reciprocal(l_sc[...], approx=True)  # (H, tq, dh)
        attn = jnp.swapaxes(attn, 0, 1).reshape(tq, H * dh)         # merge heads once
        o_ref[0] = attn.astype(o_ref.dtype)


# ---------------------------------------------------------------------------
# Kernel 3: out-projection + residual/LN1 + d_ff-tiled FFN + residual/LN2
# ---------------------------------------------------------------------------
def outproj_ffn_kernel(x_ref, a_ref, wo_ref, bo_ref, w1_ref, b1_ref, w2_ref,
                       b2_ref, g1_ref, be1_ref, g2_ref, be2_ref,
                       o_ref, y_sc, acc_sc):
    fi = pl.program_id(2)

    @pl.when(fi == 0)
    def _():
        proj = jnp.dot(a_ref[0], wo_ref[...],
                       preferred_element_type=jnp.float32) + bo_ref[...]
        # dropout (p=0.1) runs in eval mode -> identity.
        # TODO(synk): training-mode dropout would need pltpu.prng_* masking here.
        y_sc[...] = _layer_norm(x_ref[0] + proj, g1_ref[...], be1_ref[...])
        acc_sc[...] = jnp.zeros_like(acc_sc)

    # Stream one (D, tf) / (tf, D) weight tile per step; accumulate h1 @ w2 in f32.
    y16 = y_sc[...].astype(jnp.bfloat16)
    h1 = jnp.dot(y16, w1_ref[...],
                 preferred_element_type=jnp.float32) + b1_ref[...]
    h1 = jnp.maximum(h1, 0.0)                                       # ReLU
    acc_sc[...] += jnp.dot(h1.astype(jnp.bfloat16), w2_ref[...],
                           preferred_element_type=jnp.float32)

    @pl.when(fi == pl.num_programs(2) - 1)
    def _():
        f = acc_sc[...] + b2_ref[...]
        z = _layer_norm(y_sc[...] + f, g2_ref[...], be2_ref[...])
        o_ref[0] = z.astype(o_ref.dtype)


def transformer_block(x, params, num_heads, *, seq_tile=256, ff_tile=512):
    B, S, D = x.shape
    F = params["w1"].shape[1]
    assert D % num_heads == 0
    H = num_heads
    dh = D // H
    scale = 1.0 / math.sqrt(dh)

    # Tile sizes (clamped for small shapes). On v5e/v6e seq_tile can be raised
    # toward 512; keep ~256 on v7x (64 MiB VMEM) after re-checking the budget.
    ts = min(seq_tile, S)
    tq = min(seq_tile, S)
    tkv = min(seq_tile, S)
    tf = min(ff_tile, F)
    assert S % ts == 0 and S % tq == 0 and S % tkv == 0 and F % tf == 0

    f32 = jnp.float32
    bf16 = jnp.bfloat16

    # bf16 matmul datapath (MXU-native); biases / LN params stay f32 (added in f32).
    wqkv = jnp.concatenate(
        [params["wq"], params["wk"], params["wv"]], axis=1).astype(bf16)   # (D, 3D)
    bqkv = jnp.concatenate(
        [params["bq"], params["bk"], params["bv"]], axis=1).astype(f32)    # (1, 3D)
    wo = params["wo"].astype(bf16)
    w1 = params["w1"].astype(bf16)
    w2 = params["w2"].astype(bf16)

    vmem_limit = _vmem_limit_bytes()

    # ---- kernel 1: fused QKV projection ------------------------------------
    qkv_cost = pl.CostEstimate(
        flops=int(2 * B * S * D * 3 * D),
        transcendentals=0,
        bytes_accessed=int(4 * B * S * D + 2 * D * 3 * D + 4 * 3 * D
                           + 2 * 3 * B * S * D),
    )
    q, k, v = pl.pallas_call(
        functools.partial(qkv_proj_kernel, num_heads=H, scale=scale),
        out_shape=(jax.ShapeDtypeStruct((B, H, S, dh), bf16),) * 3,
        grid_spec=pltpu.PrefetchScalarGridSpec(
            num_scalar_prefetch=0,
            grid=(B, S // ts),
            in_specs=[
                pl.BlockSpec((1, ts, D), lambda b, i: (b, i, 0)),      # x
                pl.BlockSpec((D, 3 * D), lambda b, i: (0, 0)),         # wqkv
                pl.BlockSpec((1, 3 * D), lambda b, i: (0, 0)),         # bqkv
            ],
            out_specs=[pl.BlockSpec((1, H, ts, dh),
                                    lambda b, i: (b, 0, i, 0))] * 3,
        ),
        compiler_params=pltpu.CompilerParams(
            dimension_semantics=("parallel", "parallel"),
            vmem_limit_bytes=vmem_limit),
        cost_estimate=qkv_cost,
    )(x, wqkv, bqkv)

    # ---- kernel 2: flash attention ------------------------------------------
    attn_cost = pl.CostEstimate(
        flops=int(4 * B * S * S * D),
        transcendentals=int(B * H * S * S),
        bytes_accessed=int(2 * (B * S * D                      # Q (bf16)
                                + 2 * B * (S // tq) * S * D    # K,V re-streamed / q-tile
                                + B * S * D)),                 # output (bf16)
    )
    attn = pl.pallas_call(
        flash_attn_kernel,
        out_shape=jax.ShapeDtypeStruct((B, S, D), bf16),
        grid_spec=pltpu.PrefetchScalarGridSpec(
            num_scalar_prefetch=0,
            grid=(B, S // tq, S // tkv),
            in_specs=[
                pl.BlockSpec((1, H, tq, dh), lambda b, qi, ki: (b, 0, qi, 0)),
                pl.BlockSpec((1, H, tkv, dh), lambda b, qi, ki: (b, 0, ki, 0)),
                pl.BlockSpec((1, H, tkv, dh), lambda b, qi, ki: (b, 0, ki, 0)),
            ],
            out_specs=pl.BlockSpec((1, tq, D), lambda b, qi, ki: (b, qi, 0)),
            scratch_shapes=[
                pltpu.VMEM((H, tq, 1), f32),    # running max
                pltpu.VMEM((H, tq, 1), f32),    # running denominator
                pltpu.VMEM((H, tq, dh), f32),   # running numerator
            ],
        ),
        compiler_params=pltpu.CompilerParams(
            dimension_semantics=("parallel", "parallel", "arbitrary"),
            vmem_limit_bytes=vmem_limit),
        cost_estimate=attn_cost,
    )(q, k, v)

    # ---- kernel 3: out-proj + LN1 + d_ff-tiled FFN + LN2 --------------------
    ffn_cost = pl.CostEstimate(
        flops=int(2 * B * S * (D * D + 2 * D * F)),
        transcendentals=int(2 * B * S),
        bytes_accessed=int(4 * B * S * D                       # x (f32)
                           + 2 * B * S * D                     # attn (bf16)
                           + 2 * D * D                         # wo (bf16)
                           + 2 * 2 * D * F * B * (S // tq)     # w1,w2 streamed / q-tile
                           + 4 * B * S * D),                   # output (f32)
    )
    out = pl.pallas_call(
        outproj_ffn_kernel,
        out_shape=jax.ShapeDtypeStruct((B, S, D), x.dtype),
        grid_spec=pltpu.PrefetchScalarGridSpec(
            num_scalar_prefetch=0,
            grid=(B, S // tq, F // tf),
            in_specs=[
                pl.BlockSpec((1, tq, D), lambda b, qi, fi: (b, qi, 0)),   # x
                pl.BlockSpec((1, tq, D), lambda b, qi, fi: (b, qi, 0)),   # attn
                pl.BlockSpec((D, D), lambda b, qi, fi: (0, 0)),           # wo
                pl.BlockSpec((1, D), lambda b, qi, fi: (0, 0)),           # bo
                pl.BlockSpec((D, tf), lambda b, qi, fi: (0, fi)),         # w1 tile
                pl.BlockSpec((1, tf), lambda b, qi, fi: (0, fi)),         # b1 tile
                pl.BlockSpec((tf, D), lambda b, qi, fi: (fi, 0)),         # w2 tile
                pl.BlockSpec((1, D), lambda b, qi, fi: (0, 0)),           # b2
                pl.BlockSpec((1, D), lambda b, qi, fi: (0, 0)),           # gamma1
                pl.BlockSpec((1, D), lambda b, qi, fi: (0, 0)),           # beta1
                pl.BlockSpec((1, D), lambda b, qi, fi: (0, 0)),           # gamma2
                pl.BlockSpec((1, D), lambda b, qi, fi: (0, 0)),           # beta2
            ],
            out_specs=pl.BlockSpec((1, tq, D), lambda b, qi, fi: (b, qi, 0)),
            scratch_shapes=[
                pltpu.VMEM((tq, D), f32),   # y = LN1(x + attn_out)
                pltpu.VMEM((tq, D), f32),   # FFN accumulator over d_ff tiles
            ],
        ),
        compiler_params=pltpu.CompilerParams(
            dimension_semantics=("parallel", "parallel", "arbitrary"),
            vmem_limit_bytes=vmem_limit),
        cost_estimate=ffn_cost,
    )(x, attn,
      wo, params["bo"], w1, params["b1"], w2, params["b2"],
      params["gamma1"], params["beta1"], params["gamma2"], params["beta2"])
    return out


def transformer_block_ref(x, params, num_heads):
    # Pure-JAX reference matching the PyTorch forward (eval-mode dropout).
    B, S, D = x.shape
    dh = D // num_heads
    q = x @ params["wq"] + params["bq"][0]
    k = x @ params["wk"] + params["bk"][0]
    v = x @ params["wv"] + params["bv"][0]

    def split(t):
        return jnp.swapaxes(t.reshape(B, S, num_heads, dh), 1, 2)   # (B, H, S, dh)

    qh, kh, vh = split(q), split(k), split(v)
    s = jnp.einsum('bhqd,bhkd->bhqk', qh, kh) / math.sqrt(dh)
    p = jax.nn.softmax(s, axis=-1)
    a = jnp.einsum('bhqk,bhkd->bhqd', p, vh)
    a = jnp.swapaxes(a, 1, 2).reshape(B, S, D)
    attn_out = a @ params["wo"] + params["bo"][0]

    def ln(t, g, b):
        mean = jnp.mean(t, axis=-1, keepdims=True)
        var = jnp.mean((t - mean) ** 2, axis=-1, keepdims=True)
        return (t - mean) * jax.lax.rsqrt(var + 1e-5) * g[0] + b[0]

    y = ln(x + attn_out, params["gamma1"], params["beta1"])
    h1 = jnp.maximum(y @ params["w1"] + params["b1"][0], 0.0)
    f = h1 @ params["w2"] + params["b2"][0]
    return ln(y + f, params["gamma2"], params["beta2"])


def init_params(key, d_model, d_ff):
    ks = jax.random.split(key, 6)
    s = 0.02
    f32 = jnp.float32
    return {
        "wq": s * jax.random.normal(ks[0], (d_model, d_model), f32),
        "bq": jnp.zeros((1, d_model), f32),
        "wk": s * jax.random.normal(ks[1], (d_model, d_model), f32),
        "bk": jnp.zeros((1, d_model), f32),
        "wv": s * jax.random.normal(ks[2], (d_model, d_model), f32),
        "bv": jnp.zeros((1, d_model), f32),
        "wo": s * jax.random.normal(ks[3], (d_model, d_model), f32),
        "bo": jnp.zeros((1, d_model), f32),
        "w1": s * jax.random.normal(ks[4], (d_model, d_ff), f32),
        "b1": jnp.zeros((1, d_ff), f32),
        "w2": s * jax.random.normal(ks[5], (d_ff, d_model), f32),
        "b2": jnp.zeros((1, d_model), f32),
        "gamma1": jnp.ones((1, d_model), f32),
        "beta1": jnp.zeros((1, d_model), f32),
        "gamma2": jnp.ones((1, d_model), f32),
        "beta2": jnp.zeros((1, d_model), f32),
    }


if __name__ == "__main__":
    # Small shapes consistent with the module.
    B, S, d_model, num_heads, d_ff = 2, 8, 32, 4, 64

    key = jax.random.PRNGKey(0)
    kx, kp = jax.random.split(key)
    x = jax.random.normal(kx, (B, S, d_model), jnp.float32)
    params = init_params(kp, d_model, d_ff)

    out = transformer_block(x, params, num_heads)
    jax.block_until_ready(out)
    assert out.shape == (B, S, d_model), out.shape
    ref = transformer_block_ref(x, params, num_heads)
    err = float(jnp.max(jnp.abs(out - ref)))
    assert err < 2e-2, f"max abs err {err}"

    # Multi-tile path: S/tq = S/tkv = 2 and F/tf = 2 exercise the online-softmax
    # accumulation across KV tiles and the d_ff-tiled FFN accumulator.
    B2, S2, D2, H2, F2 = 2, 16, 32, 4, 256
    k2x, k2p = jax.random.split(jax.random.PRNGKey(1))
    x2 = jax.random.normal(k2x, (B2, S2, D2), jnp.float32)
    params2 = init_params(k2p, D2, F2)
    out2 = transformer_block(x2, params2, H2, seq_tile=8, ff_tile=128)
    jax.block_until_ready(out2)
    ref2 = transformer_block_ref(x2, params2, H2)
    err2 = float(jnp.max(jnp.abs(out2 - ref2)))
    assert err2 < 2e-2, f"max abs err (tiled) {err2}"

    print("KERNEL_OK")
</pallas_src>

<mosaic_0001>
module attributes {stable_mosaic.version = 11 : i64} {
  func.func @qkv_proj_kernel(%arg0: i32, %arg1: i32, %arg2: memref<1x8x32xf32, #tpu.memory_space<vmem>>, %arg3: memref<32x96xbf16, #tpu.memory_space<vmem>>, %arg4: memref<1x96xf32, #tpu.memory_space<vmem>>, %arg5: memref<1x4x8x8xbf16, #tpu.memory_space<vmem>>, %arg6: memref<1x4x8x8xbf16, #tpu.memory_space<vmem>>, %arg7: memref<1x4x8x8xbf16, #tpu.memory_space<vmem>>) attributes {dimension_semantics = [#tpu.dimension_semantics<parallel>, #tpu.dimension_semantics<parallel>], iteration_bounds = array<i64: 2, 1>, scalar_prefetch = 0 : i64, scratch_operands = 0 : i64, tpu.core_type = #tpu.core_type<tc>, window_params = [{transform_indices = @transform_0, window_bounds = array<i64: 1, 8, 32>}, {pipeline_mode = #tpu.pipeline_mode<synchronous>, transform_indices = @transform_1, window_bounds = array<i64: 32, 96>}, {pipeline_mode = #tpu.pipeline_mode<synchronous>, transform_indices = @transform_2, window_bounds = array<i64: 1, 96>}, {transform_indices = @transform_3, window_bounds = array<i64: 1, 4, 8, 8>}, {transform_indices = @transform_4, window_bounds = array<i64: 1, 4, 8, 8>}, {transform_indices = @transform_5, window_bounds = array<i64: 1, 4, 8, 8>}]} {
    %c0 = arith.constant 0 : index
    %c0_0 = arith.constant 0 : index
    %c0_1 = arith.constant 0 : index
    %0 = vector.load %arg2[%c0, %c0_0, %c0_1] : memref<1x8x32xf32, #tpu.memory_space<vmem>>, vector<1x8x32xf32>
    %1 = vector.shape_cast %0 : vector<1x8x32xf32> to vector<8x32xf32>
    %2 = arith.truncf %1 : vector<8x32xf32> to vector<8x32xbf16>
    %c0_2 = arith.constant 0 : index
    %c0_3 = arith.constant 0 : index
    %3 = vector.load %arg3[%c0_2, %c0_3] : memref<32x96xbf16, #tpu.memory_space<vmem>>, vector<32x96xbf16>
    %cst = arith.constant dense<0.000000e+00> : vector<8x96xf32>
    %4 = tpu.matmul %2, %3, %cst {dimension_numbers = #tpu.dot_dimension_numbers<[1], [0], [0], [1], [0, 0, 1, 1], [], []>} : vector<8x32xbf16>, vector<32x96xbf16>, vector<8x96xf32> -> vector<8x96xf32>
    %c0_4 = arith.constant 0 : index
    %c0_5 = arith.constant 0 : index
    %5 = vector.load %arg4[%c0_4, %c0_5] : memref<1x96xf32, #tpu.memory_space<vmem>>, vector<1x96xf32>
    %6 = vector.broadcast %5 : vector<1x96xf32> to vector<8x96xf32>
    %7 = arith.addf %4, %6 : vector<8x96xf32>
    %8 = vector.extract_strided_slice %7 {offsets = [0, 0], sizes = [8, 32], strides = [1, 1]} : vector<8x96xf32> to vector<8x32xf32>
    %cst_6 = arith.constant 0.353553385 : f32
    %9 = vector.broadcast %cst_6 : f32 to vector<8x32xf32>
    %10 = arith.mulf %8, %9 : vector<8x32xf32>
    %11 = vector.extract_strided_slice %7 {offsets = [0, 32], sizes = [8, 32], strides = [1, 1]} : vector<8x96xf32> to vector<8x32xf32>
    %12 = vector.extract_strided_slice %7 {offsets = [0, 64], sizes = [8, 32], strides = [1, 1]} : vector<8x96xf32> to vector<8x32xf32>
    %13 = vector.shape_cast %10 : vector<8x32xf32> to vector<8x4x8xf32>
    %14 = tpu.transpose %13, [1, 0, 2] : vector<8x4x8xf32> -> vector<4x8x8xf32>
    %15 = arith.truncf %14 : vector<4x8x8xf32> to vector<4x8x8xbf16>
    %c0_7 = arith.constant 0 : index
    %c0_8 = arith.constant 0 : index
    %c0_9 = arith.constant 0 : index
    %c0_10 = arith.constant 0 : index
    %16 = vector.load %arg5[%c0_7, %c0_8, %c0_9, %c0_10] : memref<1x4x8x8xbf16, #tpu.memory_space<vmem>>, vector<1x4x8x8xbf16>
    %17 = vector.shape_cast %16 : vector<1x4x8x8xbf16> to vector<4x8x8xbf16>
    %18 = vector.shape_cast %15 : vector<4x8x8xbf16> to vector<1x4x8x8xbf16>
    tpu.vector_store %arg5[%c0_7, %c0_8, %c0_9, %c0_10], %18 {strides = array<i32>} : memref<1x4x8x8xbf16, #tpu.memory_space<vmem>>, vector<1x4x8x8xbf16>,
    %19 = vector.shape_cast %11 : vector<8x32xf32> to vector<8x4x8xf32>
    %20 = tpu.transpose %19, [1, 0, 2] : vector<8x4x8xf32> -> vector<4x8x8xf32>
    %21 = arith.truncf %20 : vector<4x8x8xf32> to vector<4x8x8xbf16>
    %c0_11 = arith.constant 0 : index
    %c0_12 = arith.constant 0 : index
    %c0_13 = arith.constant 0 : index
    %c0_14 = arith.constant 0 : index
    %22 = vector.load %arg6[%c0_11, %c0_12, %c0_13, %c0_14] : memref<1x4x8x8xbf16, #tpu.memory_space<vmem>>, vector<1x4x8x8xbf16>
    %23 = vector.shape_cast %22 : vector<1x4x8x8xbf16> to vector<4x8x8xbf16>
    %24 = vector.shape_cast %21 : vector<4x8x8xbf16> to vector<1x4x8x8xbf16>
    tpu.vector_store %arg6[%c0_11, %c0_12, %c0_13, %c0_14], %24 {strides = array<i32>} : memref<1x4x8x8xbf16, #tpu.memory_space<vmem>>, vector<1x4x8x8xbf16>,
    %25 = vector.shape_cast %12 : vector<8x32xf32> to vector<8x4x8xf32>
    %26 = tpu.transpose %25, [1, 0, 2] : vector<8x4x8xf32> -> vector<4x8x8xf32>
    %27 = arith.truncf %26 : vector<4x8x8xf32> to vector<4x8x8xbf16>
    %c0_15 = arith.constant 0 : index
    %c0_16 = arith.constant 0 : index
    %c0_17 = arith.constant 0 : index
    %c0_18 = arith.constant 0 : index
    %28 = vector.load %arg7[%c0_15, %c0_16, %c0_17, %c0_18] : memref<1x4x8x8xbf16, #tpu.memory_space<vmem>>, vector<1x4x8x8xbf16>
    %29 = vector.shape_cast %28 : vector<1x4x8x8xbf16> to vector<4x8x8xbf16>
    %30 = vector.shape_cast %27 : vector<4x8x8xbf16> to vector<1x4x8x8xbf16>
    tpu.vector_store %arg7[%c0_15, %c0_16, %c0_17, %c0_18], %30 {strides = array<i32>} : memref<1x4x8x8xbf16, #tpu.memory_space<vmem>>, vector<1x4x8x8xbf16>,
    return
  }
  func.func @transform_0(%arg0: i32, %arg1: i32) -> (i32, i32, i32) {
    %c0_i32 = arith.constant 0 : i32
    %c0_i32_0 = arith.constant 0 : i32
    return %arg0, %arg1, %c0_i32 : i32, i32, i32
  }
  func.func @transform_1(%arg0: i32, %arg1: i32) -> (i32, i32) {
    %c0_i32 = arith.constant 0 : i32
    %c0_i32_0 = arith.constant 0 : i32
    %c0_i32_1 = arith.constant 0 : i32
    return %c0_i32, %c0_i32_0 : i32, i32
  }
  func.func @transform_2(%arg0: i32, %arg1: i32) -> (i32, i32) {
    %c0_i32 = arith.constant 0 : i32
    %c0_i32_0 = arith.constant 0 : i32
    %c0_i32_1 = arith.constant 0 : i32
    return %c0_i32, %c0_i32_0 : i32, i32
  }
  func.func @transform_3(%arg0: i32, %arg1: i32) -> (i32, i32, i32, i32) {
    %c0_i32 = arith.constant 0 : i32
    %c0_i32_0 = arith.constant 0 : i32
    %c0_i32_1 = arith.constant 0 : i32
    return %arg0, %c0_i32, %arg1, %c0_i32_0 : i32, i32, i32, i32
  }
  func.func @transform_4(%arg0: i32, %arg1: i32) -> (i32, i32, i32, i32) {
    %c0_i32 = arith.constant 0 : i32
    %c0_i32_0 = arith.constant 0 : i32
    %c0_i32_1 = arith.constant 0 : i32
    return %arg0, %c0_i32, %arg1, %c0_i32_0 : i32, i32, i32, i32
  }
  func.func @transform_5(%arg0: i32, %arg1: i32) -> (i32, i32, i32, i32) {
    %c0_i32 = arith.constant 0 : i32
    %c0_i32_0 = arith.constant 0 : i32
    %c0_i32_1 = arith.constant 0 : i32
    return %arg0, %c0_i32, %arg1, %c0_i32_0 : i32, i32, i32, i32
  }
}

</mosaic_0001>

<bundles_post_ra>
// kernel: tpu_custom_call.1
= control target key start
LH: loop header
LB: loop body
LE: loop exit
PB: predicated region body
PF: predicated region fallthrough
CT: control target
= control target key end

     0   :  { %s1786_s0 = inlined_call_operand.hbm [shape: f32[2,8,32], index: 0, kind: input, shape index: {}]   ;;  %s1787_s1 = inlined_call_operand.hbm [shape: bf16[32,96], index: 1, kind: input, shape index: {}]   ;;  %s1788_s2 = inlined_call_operand.vmem [shape: f32[1,96], index: 2, kind: input, shape index: {}]   ;;  %s1789_s3 = inlined_call_operand.hbm [shape: bf16[2,4,8,8], index: 3, kind: output, shape index: {0}]   ;;  %s1790_s4 = inlined_call_operand.hbm [shape: bf16[2,4,8,8], index: 4, kind: output, shape index: {1}]   ;;  %s1791_s5 = inlined_call_operand.hbm [shape: bf16[2,4,8,8], index: 5, kind: output, shape index: {2}]  }
   0x1   :  { %1795 = sst [smem:[#allocation16_spill]] %s1787_s1 }
   0x2   :  { %11 = vsyncpa [#allocation3], 0 }
   0x3   :  { %13 = vsyncpa [#allocation3 + $0x1], 0 }
   0x4   :  { %14 = vsyncpa [#allocation6], 0 }
   0x5   :  { %15 = vsyncpa [#allocation4], 0 }
   0x6   :  { %17 = vsyncpa [#allocation4 + $0x1], 0 }
   0x7   :  { %18 = vsyncpa [#allocation9], 0 }
   0x8   :  { %20 = vsyncpa [#allocation9 + $0x1], 0  ;;  %s1445_s18 = smov 0   ;;  %s1447_s19 = smov 0  }
   0x9   :  { %s1449_s20 = smov 0   ;;  %s1451_s21 = smov 0  }
   0xa   :  { %s1453_s22 = smov 0   ;;  %s1455_s23 = smov 0  }
   0xb LB: > { %s1476_s24 = sadd.s32 4294967295, %s1396_s23   ;;  %s1792_s25 = sadd.s32 4294967294, %s1396_s23   ;;  %s1396_s23 = sphi %s1455_s23, %s26_s23   ;;  %s1392_s22 = sphi %s1453_s22, %s1816_s22   ;;  %s1388_s21 = sphi %s1451_s21, %s1815_s21   ;;  %s1384_s20 = sphi %s1449_s20, %s1814_s20   ;;  %s1380_s19 = sphi %s1447_s19, %s1813_s19   ;;  %s1376_s18 = sphi %s1445_s18, %s1812_s18  }
   0xc   : > { %p60_p0 = scmp.ne.s32.totalorder %s1380_s19, %s1376_s18  ;;  %p1794_p1 = scmp.eq.s32.totalorder %s1476_s24, 0 }
   0xd   : > { %p134_p3 = scmp.eq.s32.totalorder %s1792_s25, 1  ;;  %p1059_p5 = scmp.ge.s32.totalorder %s1396_s23, 1 }
   0xe   : > { %p1487_p4 = por %p1794_p1, %p60_p0  ;;  %p197_p7 = scmp.lt.s32.totalorder %s1396_s23, 3 }
   0xf   : > { %p1492_p6 = por %p134_p3, %p60_p0  ;;  %s1398_s29 = smov [#allocation5]  }
  0x10   : > { %p1497_p8 = pnand %p1059_p5, %p197_p7  ;;  %s209_s30 = sshll.u32 %s1398_s29, 4  ;;  %s210_s30 = int_to_ptr.vmem [resolvable:$true] %s209_s30 }
  0x11   : > { %s1797_s27 = scalar_select %p1492_p6, 1, 0 }
  0x12   : > { %p1117_p9 = pneg %p1497_p8  ;;  %s38_s7 = sadd.s32 1, %s1392_s22 }
  0x13   : > { %s1213_s8 = scalar_lea.vmem %s210_s30, 256  ;;  %p1221_p5 = scmp.lt.s32.totalorder %s210_s30, %s210_s30 }
  0x14   : > { %p1506_p11 = pnand %p1117_p9, %p1794_p1  ;;  %p1214_p13 = scmp.ne.s32.totalorder %s210_s30, %s1213_s8 }
  0x15   : > { %p1222_p7 = scmp.lt.s32.totalorder %s1213_s8, %s1213_s8 }
  0x16   : > { %p1204_p12 = pneg %p1506_p11 }
  0x17   : > { %p1223_p2 = por %p1222_p7, %p1221_p5 }
  0x18   : > { %p1216_p0 = pnand %p1214_p13, %p1204_p12 }
  0x1a   : > { %p1217_p3 = pneg %p1216_p0 }
  0x1c   : > { %p1224_p6 = pnand %p1223_p2, %p1217_p3 }
  0x1e   : > { %1227 = shalt.err (!%p1224_p6)
}
  0x1f   : > { %s1399_s9 = smov 64   ;;  %s1400_s10 = smov 4  }
  0x20   : > { %s1800_s1 = sld [smem:[#allocation16_spill]]  ;;  %p40_p2 = scmp.ge.s32.totalorder %s38_s7, 2 }
  0x21   : > { %s47_s13 = sadd.s32 1, %s1384_s20  ;;  %p54_p6 = scmp.ne.s32.totalorder %s1384_s20, %s1380_s19 }
  0x22   : > { %p55_p9 = scmp.eq.s32.totalorder %s1396_s23, 0  ;;  %s1818_s7 = smov (%p40_p2, %s38_s7), 0 }
  0x23   : > { %1801 = sst [smem:[#allocation15_spill]] %s1818_s7  ;;  %p1803_p13 = scmp.eq.s32.totalorder %s1476_s24, 1 }
  0x24   : > { %p1524_p12 = por %p55_p9, %p54_p6  ;;  %s42_s16 = ssub.s32 %s1392_s22, %s1818_s7 }
  0x25   : > { %p1530_p0 = por %p1803_p13, %p54_p6  ;;  %p1136_p3 = scmp.lt.s32.totalorder %s1396_s23, 2 }
  0x26   : > { %1120 = dma.hbm_to_vmem [thread:$0]  (!%p1506_p11), %s1800_s1, 256, %s210_s30, [#allocation6], %s1399_s9, %s1399_s9, %s1400_s10  }
  0x27   : > { %p45_p11 = scmp.eq.s32.totalorder %s42_s16, 0  ;;  %s226_s17 = sand.u32 1, %s1384_s20  }
  0x28   : > { %s1062_s29 = sshll.u32 %s226_s17, 3  ;;  %s1063_s6 = sshll.u32 %s1392_s22, 7 }
  0x29   : > { %s1539_s30 = scalar_select %p45_p11, %s1384_s20, %s47_s13  }
  0x2a   : > { %s236_s10 = scalar_lea.hbm %s1786_s0, %s1063_s6  ;;  %s230_s11 = scalar_lea.vmem [#allocation2], %s1062_s29 }
  0x2b   : > { %s238_s12 = sshll.u32 %s230_s11, 4  ;;  %p1547_p5 = pnand %p1136_p3, %p1524_p12  ;;  %s239_s12 = int_to_ptr.vmem [resolvable:$true] %s238_s12 }
  0x2c   : > { %s227_s1 = scalar_lea.sflag [#allocation3], %s226_s17  ;;  %s1241_s16 = scalar_lea.vmem %s239_s12, 128 }
  0x2d   : > { %p1230_p7 = pneg %p1547_p5  ;;  %p1242_p2 = scmp.ne.s32.totalorder %s239_s12, %s1241_s16 }
  0x2e   : > { %s1401_s13 = smov [#allocation2]  }
  0x2f   : > { %p1244_p6 = pnand %p1242_p2, %p1230_p7  ;;  %s1246_s7 = sshll.u32 %s1401_s13, 4  ;;  %s1247_s7 = int_to_ptr.vmem [resolvable:$false] %s1246_s7 }
  0x30   : > { %s1248_s6 = scalar_lea.vmem %s1247_s7, 256  ;;  %p1249_p13 = scmp.lt.s32.totalorder %s239_s12, %s1247_s7 }
  0x31   : > { %p1245_p9 = pneg %p1244_p6  ;;  %p1250_p11 = scmp.lt.s32.totalorder %s1248_s6, %s1241_s16 }
  0x33   : > { %p1251_p10 = por %p1250_p11, %p1249_p13 }
  0x35   : > { %p1252_p1 = pnand %p1251_p10, %p1245_p9 }
  0x37   : > { %1255 = shalt.err (!%p1252_p1)
}
  0x38   : > { %1124 = dma.hbm_to_vmem [thread:$0]  (!%p1547_p5), %s236_s10, 128, %s239_s12, %s227_s1  }
  0x39   : > { %247 = sbr.rel (%p1497_p8) target bundleno = 562 (0x232), region = 32  ;;  %s1558_s14 = sand.u32 (!%p1497_p8), 1, %s1380_s19  }
  0x3a   : > { %s1065_s17 = sshll.u32 (!%p1497_p8), %s1558_s14, 3  ;;  %s250_s29 = scalar_lea.sflag (!%p1497_p8), [#allocation3], %s1558_s14 }
  0x3b   : > { %s253_s8 = scalar_lea.vmem (!%p1497_p8), [#allocation2], %s1065_s17 }
  0x3e   : > { %1359 = dma.done.wait (%p1487_p4), %s250_s29, 128  }
  0x3f   : > { %1361 = vsyncadd (%p1487_p4), %s250_s29, 4294967168  ;;  %p1806_p1 = scmp.eq.s32.totalorder %s1476_s24, 0 }
  0x41   : > { %1363 = dma.done.wait (%p1806_p1), [#allocation6], 256   ;;  %p1807_p10 = pmov %p1806_p1 }
  0x42   : > { %v1402_v0 = vmov 0.0   ;;  %vm1403_vm0 = vmmov 0   ;;  %v1200_v1 = vld [vmem:[#allocation5 + $0x8] sm:$0xff]   ;;  %v1201_v2 = vld [vmem:[#allocation5] sm:$0xff]   ;;  %v295_v3 = vld [vmem:[%s253_s8] sm:$0xff]  ;;  %vm320_vm1 = vcmask 261120   ;;  %v380_v16 = vlaneseq }
  0x43   : > { %1365 = vsyncadd (%p1807_p10), [#allocation6], 4294967040  ;;  %1097 = vmatprep.subr.bf16.mxu0 %v1402_v0  ;;  %1101 = vmatprep.mubr.msk.bf16.mxu0 %vm1403_vm0, %v1402_v0  ;;  %v296_v4 = vpack.c.bf16 %v295_v3, %v295_v3  ;;  %v1070_v5 = vld [vmem:[%s1788_s2] ss:$0 sm:$0xff]  ;;  %s1404_s26 = smov 104   ;;  %s1405_s28 = smov 120  }
  0x44   : > { %1098 = vmatpush3.bf16.msra.mxu0 %v1200_v1  ;;  %s1406_s7 = smov 96   ;;  %s1407_s9 = smov 112   ;;  %v1409_v14 = vmov 1983009808   ;;  %v1410_v19 = vmov 1934713408  }
  0x45   : > { %1099 = vmatprep.subr.bf16.mxu0 %v1402_v0  ;;  %s1408_s10 = smov 64   ;;  %v378_v15 = vunpack.c.l.s4 %v1409_v14  ;;  %v410_v20 = vunpack.c.l.s4 %v1410_v19  ;;  %v381_v22 = vshrl.u32 %v380_v16, 7  ;;  %s1598_s11 = sshll.u32 %s1558_s14, 4  ;;  %vm515_vm2 = vcmask 60416  }
  0x46   : > { %s1605_s12 = sshll.u32 %s1388_s21, 8  ;;  %s279_s16 = scalar_lea.vmem [#allocation7], %s1598_s11 }
  0x47   : > { %v379_v21 = vunpack.c.0.s8 %v378_v15  ;;  %v411_v25 = vunpack.c.0.s8 %v410_v20  ;;  %s864_s13 = sshll.u32 %s279_s16, 4  ;;  %s1612_s29 = scalar_lea.hbm %s1789_s3, %s1605_s12  ;;  %s1614_s13 = int_to_ptr.vmem [resolvable:$true] %s864_s13 }
  0x48   : > { %1100 = vmatpush3.bf16.msra.mxu0 %v1201_v2  ;;  %s840_s21 = scalar_lea.sflag [#allocation4], %s1558_s14  ;;  %s1256_s8 = scalar_lea.vmem %s1614_s13, 256 }
  0x49   : > { %v1580_v26 = vsub.s32 %v379_v21, %v381_v22  ;;  %v1583_v33 = vsub.s32 %v411_v25, %v381_v22  ;;  %p1257_p4 = scmp.ne.s32.totalorder %s1614_s13, %s1256_s8  ;;  %s1411_s1 = smov [#allocation7]  }
  0x4a   : > { %s1260_s25 = sshll.u32 %s1411_s1, 4  ;;  %s1261_s25 = int_to_ptr.vmem [resolvable:$false] %s1260_s25 }
  0x4b   : > { %1102 = vmatmul.mubr.msk.bf16.vlgmr.msra.gmra.mxu0 %vm320_vm1, %v296_v4  ;;  %p1258_p8 = pnand %p1257_p4, %p1530_p0  ;;  %p1263_p3 = scmp.lt.s32.totalorder %s1614_s13, %s1261_s25 }
  0x4d   : > { %p1259_p12 = pneg %p1258_p8 }
 0x10b   : > { %v358_v6 = vpop.f32.mrf.mxu0 }
 0x10c   : > { %v359_v7 = vadd.f32 %v1070_v5, %v358_v6 }
 0x10d   : > { %v1103_v8 = vpop.f32.mrf.mxu0 }
 0x10e   : > { %525 = vrot.lane.b32.xlu1 %v359_v7, %s1404_s26  ;;  %521 = vrot.lane.b32.xlu0 %v359_v7, %s1405_s28  ;;  %v364_v11 = vmul.f32 0.35355338, %v359_v7 }
 0x10f   : > { %v361_v9 = vpop.f32.mrf.mxu0 }
 0x111   : > { %v1104_v10 = vpop.f32.mrf.mxu0 }
 0x112   : > { %527 = vrot.lane.b32.xlu1 %v359_v7, %s1406_s7  ;;  %523 = vrot.lane.b32.xlu0 %v359_v7, %s1407_s9 }
 0x116   : > { %683 = vrot.lane.b32.xlu0 %v359_v7, %s1408_s10  ;;  %366 = vrot.lane.b32.xlu1 %v364_v11, %s1405_s28 }
 0x11a   : > { %369 = vrot.lane.b32.xlu0 %v364_v11, %s1407_s9  ;;  %372 = vrot.lane.b32.xlu1 %v364_v11, %s1404_s26  ;;  %s1262_s26 = scalar_lea.vmem %s1261_s25, 512 }
 0x11b   : > { %p1264_p5 = scmp.lt.s32.totalorder %s1262_s26, %s1256_s8 }
 0x11d   : > { %p1265_p7 = por %p1264_p5, %p1263_p3 }
 0x11f   : > { %p1266_p2 = pnand %p1265_p7, %p1259_p12 }
 0x180   : > { %v526_v12 = vpop.permute.xlu1 %525  ;;  %v522_v13 = vpop.permute.xlu0 %521 }
 0x181   : > { %529 = vrot.lane.b32.xlu0 %v522_v13, %s1406_s7 }
 0x184   : > { %v1574_v17 = vpop.permute.xlu1 %527  ;;  %v524_v18 = vpop.permute.xlu0 %523 }
 0x185   : > { %533 = vrot.lane.b32.xlu0 %v526_v12, %s1406_s7  ;;  %531 = vrot.lane.b32.xlu1 %v524_v18, %s1406_s7 }
 0x188   : > { %v1576_v23 = vpop.permute.xlu0 %683  ;;  %v367_v24 = vpop.permute.xlu1 %366 }
 0x189   : > { %687 = vrot.lane.b32.xlu0 %v524_v18, %s1408_s10  ;;  %685 = vrot.lane.b32.xlu1 %v522_v13, %s1408_s10 }
 0x18c   : > { %v370_v27 = vpop.permute.xlu0 %369  ;;  %v373_v28 = vpop.permute.xlu1 %372 }
 0x18d   : > { %v375_v29 = vcombine.low %v364_v11, %v370_v27  ;;  %v376_v30 = vcombine.high %v364_v11, %v370_v27  ;;  %v391_v31 = vcombine.low %v367_v24, %v373_v28  ;;  %v392_v32 = vcombine.high %v367_v24, %v373_v28  ;;  %689 = vrot.lane.b32.xlu1 %v526_v12, %s1408_s10 }
 0x18f   : > { %v383_v34 = vrot.slane %v375_v29, %v1580_v26  ;;  %v390_v35 = vrot.slane %v376_v30, %v1580_v26  ;;  %v399_v36 = vrot.slane %v391_v31, %v1580_v26  ;;  %v406_v37 = vrot.slane %v392_v32, %v1580_v26 }
 0x191   : > { %v407_v38 = vcombine.low %v383_v34, %v399_v36  ;;  %v408_v39 = vcombine.high %v383_v34, %v399_v36  ;;  %v423_v40 = vcombine.low %v390_v35, %v406_v37  ;;  %v424_v41 = vcombine.high %v390_v35, %v406_v37 }
 0x193   : > { %v415_v42 = vrot.slane %v407_v38, %v1583_v33  ;;  %v422_v43 = vrot.slane %v408_v39, %v1583_v33  ;;  %v431_v44 = vrot.slane %v423_v40, %v1583_v33  ;;  %v438_v45 = vrot.slane %v424_v41, %v1583_v33 }
 0x195   : > { %v443_v46 = vcombine.low %v415_v42, %v422_v43  ;;  %v1074_v47 = vcombine.high %v415_v42, %v422_v43  ;;  %v459_v48 = vcombine.low %v431_v44, %v438_v45  ;;  %v1075_v49 = vcombine.high %v431_v44, %v438_v45 }
 0x197   : > { %v450_v50 = vrot.slane %v443_v46, %v1580_v26  ;;  %v458_v51 = vrot.slane %v1074_v47, %v1580_v26  ;;  %v466_v52 = vrot.slane %v459_v48, %v1580_v26  ;;  %v474_v53 = vrot.slane %v1075_v49, %v1580_v26 }
 0x199   : > { %v475_v54 = vcombine.low %v450_v50, %v458_v51  ;;  %v476_v55 = vcombine.high %v450_v50, %v458_v51  ;;  %v491_v56 = vcombine.low %v466_v52, %v474_v53  ;;  %v492_v57 = vcombine.high %v466_v52, %v474_v53 }
 0x19b   : > { %v483_v58 = vrot.slane %v475_v54, %v1583_v33  ;;  %v490_v59 = vrot.slane %v476_v55, %v1583_v33  ;;  %v499_v60 = vrot.slane %v491_v56, %v1583_v33  ;;  %v506_v61 = vrot.slane %v492_v57, %v1583_v33 }
 0x19d   : > { %v507_v62 = vcombine.low %v483_v58, %v499_v60  ;;  %v508_v63 = vcombine.high %v483_v58, %v499_v60  ;;  %v509_v0 = vcombine.low %v490_v59, %v506_v61  ;;  %v510_v1 = vcombine.high %v490_v59, %v506_v61 }
 0x19f   : > { %v511_v2 = vpack.c.bf16 %v507_v62, %v507_v62  ;;  %v512_v3 = vpack.c.bf16 %v508_v63, %v508_v63  ;;  %v513_v4 = vpack.c.bf16 %v509_v0, %v509_v0  ;;  %v514_v5 = vpack.c.bf16 %v510_v1, %v510_v1 }
 0x1a1   : > { %516 = vst.msk [vmem:[%s279_s16] sm:$0xf] %vm515_vm2, %v511_v2  ;;  %517 = vst.msk [vmem:[%s279_s16 + $0x4] sm:$0xf] %vm515_vm2, %v512_v3 }
 0x1a2   : > { %518 = vst.msk [vmem:[%s279_s16 + $0x8] sm:$0xf] %vm515_vm2, %v513_v4  ;;  %519 = vst.msk [vmem:[%s279_s16 + $0xc] sm:$0xf] %vm515_vm2, %v514_v5 }
 0x1a3   : > { %1269 = shalt.err (!%p1266_p2)
}
 0x1a4   : > { %s1270_s28 = scalar_lea.hbm %s1612_s29, 256  ;;  %s1274_s16 = scalar_lea.hbm %s1789_s3, 512 }
 0x1a5   : > { %p1271_p6 = scmp.ne.s32.totalorder %s1612_s29, %s1270_s28  ;;  %p1275_p11 = scmp.lt.s32.totalorder %s1612_s29, %s1789_s3 }
 0x1a6   : > { %p1276_p1 = scmp.lt.s32.totalorder %s1274_s16, %s1270_s28 }
 0x1a7   : > { %p1272_p9 = pnand %p1271_p6, %p1530_p0 }
 0x1a8   : > { %p1277_p10 = por %p1276_p1, %p1275_p11 }
 0x1a9   : > { %p1273_p13 = pneg %p1272_p9 }
 0x1ab   : > { %p1278_p4 = pnand %p1277_p10, %p1273_p13 }
 0x1ad   : > { %1281 = shalt.err (!%p1278_p4)
}
 0x1ae   : > { %s1412_s8 = smov 4   ;;  %s844_s14 = sand.u32 1, %s1476_s24  }
 0x1af   : > { %1111 = dma.vmem_to_hbm [thread:$0]  (%p1530_p0), %s1614_s13, 256, %s1612_s29, %s840_s21, %s1408_s10, %s1408_s10, %s1412_s8  }
 0x1b0   : > { %s286_s13 = scalar_lea.vmem [#allocation8], %s1598_s11  ;;  %s1680_s25 = scalar_lea.hbm %s1790_s4, %s1605_s12 }
 0x1b1   : > { %s881_s29 = sshll.u32 %s286_s13, 4  ;;  %s1694_s26 = scalar_lea.sflag [#allocation9], %s844_s14  ;;  %s1682_s29 = int_to_ptr.vmem [resolvable:$true] %s881_s29 }
 0x1b2   : > { %s1282_s28 = scalar_lea.vmem %s1682_s29, 256  ;;  %s1413_s7 = smov [#allocation8]  }
 0x1b3   : > { %p1283_p8 = scmp.ne.s32.totalorder %s1682_s29, %s1282_s28  ;;  %s1286_s9 = sshll.u32 %s1413_s7, 4  ;;  %s1287_s9 = int_to_ptr.vmem [resolvable:$false] %s1286_s9 }
 0x1b4   : > { %s1288_s16 = scalar_lea.vmem %s1287_s9, 512  ;;  %p1289_p5 = scmp.lt.s32.totalorder %s1682_s29, %s1287_s9 }
 0x1b5   : > { %p1284_p12 = pnand %p1283_p8, %p1530_p0  ;;  %p1290_p7 = scmp.lt.s32.totalorder %s1288_s16, %s1282_s28 }
 0x1b7   : > { %p1285_p3 = pneg %p1284_p12  ;;  %p1291_p2 = por %p1290_p7, %p1289_p5 }
 0x1b9   : > { %p1292_p6 = pnand %p1291_p2, %p1285_p3 }
 0x1f3   : > { %v530_v6 = vpop.permute.xlu0 %529 }
 0x1f7   : > { %v534_v7 = vpop.permute.xlu0 %533  ;;  %v532_v8 = vpop.permute.xlu1 %531 }
 0x1f8   : > { %v555_v9 = vcombine.low %v530_v6, %v534_v7  ;;  %v556_v10 = vcombine.high %v530_v6, %v534_v7  ;;  %v539_v11 = vcombine.low %v1574_v17, %v532_v8  ;;  %v540_v12 = vcombine.high %v1574_v17, %v532_v8 }
 0x1fa   : > { %v563_v13 = vrot.slane %v555_v9, %v1580_v26  ;;  %v570_v14 = vrot.slane %v556_v10, %v1580_v26  ;;  %v547_v15 = vrot.slane %v539_v11, %v1580_v26  ;;  %v554_v16 = vrot.slane %v540_v12, %v1580_v26 }
 0x1fb   : > { %v686_v18 = vpop.permute.xlu1 %685  ;;  %v688_v24 = vpop.permute.xlu0 %687 }
 0x1fc   : > { %v571_v19 = vcombine.low %v547_v15, %v563_v13  ;;  %v572_v20 = vcombine.high %v547_v15, %v563_v13  ;;  %v587_v21 = vcombine.low %v554_v16, %v570_v14  ;;  %v588_v22 = vcombine.high %v554_v16, %v570_v14 }
 0x1fd   : > { %v695_v29 = vcombine.low %v1576_v23, %v688_v24  ;;  %v696_v30 = vcombine.high %v1576_v23, %v688_v24 }
 0x1fe   : > { %v579_v25 = vrot.slane %v571_v19, %v1583_v33  ;;  %v586_v27 = vrot.slane %v572_v20, %v1583_v33  ;;  %v595_v17 = vrot.slane %v587_v21, %v1583_v33  ;;  %v602_v28 = vrot.slane %v588_v22, %v1583_v33 }
 0x1ff   : > { %v690_v31 = vpop.permute.xlu1 %689  ;;  %v703_v43 = vrot.slane %v695_v29, %v1580_v26  ;;  %v710_v23 = vrot.slane %v696_v30, %v1580_v26 }
 0x200   : > { %v607_v32 = vcombine.low %v579_v25, %v586_v27  ;;  %v1076_v34 = vcombine.high %v579_v25, %v586_v27  ;;  %v623_v35 = vcombine.low %v595_v17, %v602_v28  ;;  %v1077_v36 = vcombine.high %v595_v17, %v602_v28 }
 0x201   : > { %v711_v37 = vcombine.low %v686_v18, %v690_v31  ;;  %v712_v38 = vcombine.high %v686_v18, %v690_v31 }
 0x202   : > { %v614_v39 = vrot.slane %v607_v32, %v1580_v26  ;;  %v622_v40 = vrot.slane %v1076_v34, %v1580_v26  ;;  %v630_v41 = vrot.slane %v623_v35, %v1580_v26  ;;  %v638_v42 = vrot.slane %v1077_v36, %v1580_v26 }
 0x203   : > { %v719_v44 = vrot.slane %v711_v37, %v1580_v26  ;;  %v726_v45 = vrot.slane %v712_v38, %v1580_v26 }
 0x204   : > { %v639_v46 = vcombine.low %v614_v39, %v622_v40  ;;  %v640_v47 = vcombine.high %v614_v39, %v622_v40  ;;  %v655_v48 = vcombine.low %v630_v41, %v638_v42  ;;  %v656_v49 = vcombine.high %v630_v41, %v638_v42 }
 0x205   : > { %v727_v50 = vcombine.low %v703_v43, %v719_v44  ;;  %v728_v51 = vcombine.high %v703_v43, %v719_v44  ;;  %v743_v52 = vcombine.low %v710_v23, %v726_v45  ;;  %v744_v53 = vcombine.high %v710_v23, %v726_v45 }
 0x206   : > { %v647_v54 = vrot.slane %v639_v46, %v1583_v33  ;;  %v654_v55 = vrot.slane %v640_v47, %v1583_v33  ;;  %v663_v56 = vrot.slane %v655_v48, %v1583_v33  ;;  %v670_v57 = vrot.slane %v656_v49, %v1583_v33 }
 0x207   : > { %v735_v58 = vrot.slane %v727_v50, %v1583_v33  ;;  %v742_v59 = vrot.slane %v728_v51, %v1583_v33  ;;  %v751_v60 = vrot.slane %v743_v52, %v1583_v33  ;;  %v758_v61 = vrot.slane %v744_v53, %v1583_v33 }
 0x208   : > { %v671_v62 = vcombine.low %v647_v54, %v663_v56  ;;  %v672_v63 = vcombine.high %v647_v54, %v663_v56  ;;  %v673_v0 = vcombine.low %v654_v55, %v670_v57  ;;  %v674_v1 = vcombine.high %v654_v55, %v670_v57 }
 0x209   : > { %v763_v2 = vcombine.low %v735_v58, %v742_v59  ;;  %v1078_v3 = vcombine.high %v735_v58, %v742_v59  ;;  %v779_v4 = vcombine.low %v751_v60, %v758_v61  ;;  %v1079_v5 = vcombine.high %v751_v60, %v758_v61 }
 0x20a   : > { %v675_v6 = vpack.c.bf16 %v671_v62, %v671_v62  ;;  %v676_v7 = vpack.c.bf16 %v672_v63, %v672_v63  ;;  %v677_v8 = vpack.c.bf16 %v673_v0, %v673_v0  ;;  %v678_v9 = vpack.c.bf16 %v674_v1, %v674_v1 }
 0x20b   : > { %v770_v10 = vrot.slane %v763_v2, %v1580_v26  ;;  %v778_v11 = vrot.slane %v1078_v3, %v1580_v26  ;;  %v786_v12 = vrot.slane %v779_v4, %v1580_v26  ;;  %v794_v13 = vrot.slane %v1079_v5, %v1580_v26 }
 0x20c   : > { %679 = vst.msk [vmem:[%s286_s13] sm:$0xf] %vm515_vm2, %v675_v6  ;;  %680 = vst.msk [vmem:[%s286_s13 + $0x4] sm:$0xf] %vm515_vm2, %v676_v7 }
 0x20d   : > { %681 = vst.msk [vmem:[%s286_s13 + $0x8] sm:$0xf] %vm515_vm2, %v677_v8  ;;  %682 = vst.msk [vmem:[%s286_s13 + $0xc] sm:$0xf] %vm515_vm2, %v678_v9  ;;  %v795_v14 = vcombine.low %v770_v10, %v778_v11  ;;  %v796_v15 = vcombine.high %v770_v10, %v778_v11  ;;  %v811_v16 = vcombine.low %v786_v12, %v794_v13 }
 0x20e   : > { %v812_v18 = vcombine.high %v786_v12, %v794_v13 }
 0x20f   : > { %1295 = shalt.err (!%p1292_p6)
}
 0x210   : > { %s1296_s24 = scalar_lea.hbm %s1680_s25, 256  ;;  %s1300_s14 = scalar_lea.hbm %s1790_s4, 512 }
 0x211   : > { %p1297_p9 = scmp.ne.s32.totalorder %s1680_s25, %s1296_s24  ;;  %p1301_p1 = scmp.lt.s32.totalorder %s1680_s25, %s1790_s4 }
 0x212   : > { %p1302_p10 = scmp.lt.s32.totalorder %s1300_s14, %s1296_s24 }
 0x213   : > { %p1298_p13 = pnand %p1297_p9, %p1530_p0 }
 0x214   : > { %p1303_p4 = por %p1302_p10, %p1301_p1 }
 0x215   : > { %p1299_p11 = pneg %p1298_p13 }
 0x217   : > { %p1304_p8 = pnand %p1303_p4, %p1299_p11 }
 0x219   : > { %1307 = shalt.err (!%p1304_p8)
}
 0x21a   : > { %1112 = dma.vmem_to_hbm [thread:$0]  (%p1530_p0), %s1682_s29, 256, %s1680_s25, %s1694_s26, %s1408_s10, %s1408_s10, %s1412_s8   ;;  %v803_v26 = vrot.slane %v795_v14, %v1583_v33  ;;  %v810_v19 = vrot.slane %v796_v15, %v1583_v33  ;;  %v819_v20 = vrot.slane %v811_v16, %v1583_v33  ;;  %v826_v21 = vrot.slane %v812_v18, %v1583_v33 }
 0x21b   : > { %s293_s1 = scalar_lea.vmem [#allocation10], %s1598_s11  ;;  %s1729_s7 = scalar_lea.hbm %s1791_s5, %s1605_s12 }
 0x21c   : > { %s898_s28 = sshll.u32 %s293_s1, 4  ;;  %v827_v22 = vcombine.low %v803_v26, %v819_v20  ;;  %v828_v24 = vcombine.high %v803_v26, %v819_v20  ;;  %v829_v25 = vcombine.low %v810_v19, %v826_v21  ;;  %v830_v27 = vcombine.high %v810_v19, %v826_v21  ;;  %s1414_s12 = smov [#allocation10]   ;;  %s1731_s28 = int_to_ptr.vmem [resolvable:$true] %s898_s28 }
 0x21d   : > { %s1308_s11 = scalar_lea.vmem %s1731_s28, 256  ;;  %s1312_s9 = sshll.u32 %s1414_s12, 4  ;;  %s1313_s9 = int_to_ptr.vmem [resolvable:$false] %s1312_s9 }
 0x21e   : > { %v831_v17 = vpack.c.bf16 %v827_v22, %v827_v22  ;;  %v832_v28 = vpack.c.bf16 %v828_v24, %v828_v24  ;;  %v833_v29 = vpack.c.bf16 %v829_v25, %v829_v25  ;;  %v834_v30 = vpack.c.bf16 %v830_v27, %v830_v27  ;;  %p1309_p12 = scmp.ne.s32.totalorder %s1731_s28, %s1308_s11  ;;  %s1314_s16 = scalar_lea.vmem %s1313_s9, 512 }
 0x21f   : > { %p1315_p7 = scmp.lt.s32.totalorder %s1731_s28, %s1313_s9  ;;  %p1316_p2 = scmp.lt.s32.totalorder %s1314_s16, %s1308_s11 }
 0x220   : > { %835 = vst.msk [vmem:[%s293_s1] sm:$0xf] %vm515_vm2, %v831_v17  ;;  %836 = vst.msk [vmem:[%s293_s1 + $0x4] sm:$0xf] %vm515_vm2, %v832_v28  ;;  %p1310_p3 = pnand %p1309_p12, %p1530_p0 }
 0x221   : > { %837 = vst.msk [vmem:[%s293_s1 + $0x8] sm:$0xf] %vm515_vm2, %v833_v29  ;;  %838 = vst.msk [vmem:[%s293_s1 + $0xc] sm:$0xf] %vm515_vm2, %v834_v30  ;;  %p1317_p6 = por %p1316_p2, %p1315_p7 }
 0x222   : > { %p1311_p5 = pneg %p1310_p3 }
 0x224   : > { %p1318_p9 = pnand %p1317_p6, %p1311_p5 }
 0x226   : > { %1321 = shalt.err (!%p1318_p9)
}
 0x227   : > { %s1322_s24 = scalar_lea.hbm %s1729_s7, 256  ;;  %s1326_s14 = scalar_lea.hbm %s1791_s5, 512 }
 0x228   : > { %p1323_p13 = scmp.ne.s32.totalorder %s1729_s7, %s1322_s24  ;;  %p1327_p10 = scmp.lt.s32.totalorder %s1729_s7, %s1791_s5 }
 0x229   : > { %p1328_p4 = scmp.lt.s32.totalorder %s1326_s14, %s1322_s24 }
 0x22a   : > { %p1324_p11 = pnand %p1323_p13, %p1530_p0 }
 0x22b   : > { %p1329_p8 = por %p1328_p4, %p1327_p10 }
 0x22c   : > { %p1325_p1 = pneg %p1324_p11 }
 0x22e   : > { %p1330_p12 = pnand %p1329_p8, %p1325_p1 }
 0x230   : > { %1333 = shalt.err (!%p1330_p12)
}
 0x231   : > { %1113 = dma.vmem_to_hbm [thread:$0]  (%p1530_p0), %s1731_s28, 256, %s1729_s7, %s1694_s26, %s1408_s10, %s1408_s10, %s1412_s8  }
 0x232 PF: > { %s913_s1 = sand.u32 1, %s1376_s18   ;;  %p1808_p3 = scmp.ne.s32.totalorder %s1797_s27, 0 }
 0x233   : > { %p1809_p5 = scmp.ge.s32.totalorder %s1396_s23, 2  ;;  %s914_s29 = scalar_lea.sflag [#allocation4], %s913_s1 }
 0x235   : > { %p1126_p7 = pnand %p1809_p5, %p1808_p3 }
 0x237   : > { %p1127_p2 = pneg %p1126_p7 }
 0x239   : > { %1367 = dma.done.wait (%p1127_p2), %s914_s29, 256  }
 0x23a   : > { %1369 = vsyncadd (%p1127_p2), %s914_s29, 4294967040  ;;  %s1810_s15 = sadd.s32 4294967294, %s1396_s23  }
 0x23b   : > { %s922_s25 = sand.u32 1, %s1810_s15  }
 0x23c   : > { %s923_s11 = scalar_lea.sflag [#allocation9], %s922_s25 }
 0x23d   : > { %1371 = dma.done.wait (%p1127_p2), %s923_s11, 512  }
 0x23e   : > { %1373 = vsyncadd (%p1127_p2), %s923_s11, 4294966784  ;;  %s26_s23 = sadd.s32 1, %s1396_s23   ;;  %s1811_s27 = sld [smem:[#allocation15_spill]] }
 0x23f   : > { %p23_p0 = scmp.ge.s32.totalorder %s26_s23, 4   ;;  %s1812_s18 = smov %s1380_s19 }
 0x240   : > { %s1813_s19 = smov %s1384_s20  ;;  %s1814_s20 = smov %s1539_s30 }
 0x241   : > { %s1815_s21 = smov %s1392_s22  ;;  %25 = sbr.rel (!%p23_p0) target bundleno = 11 (0xb), region = 113 }
 0x244   : > { %s1816_s22 = smov %s1811_s27 }
 0x246   :  { %937 = vsyncpa [#allocation3], 1 }
 0x247   :  { %939 = vsyncpa [#allocation3 + $0x1], 1 }
 0x248   :  { %940 = vsyncpa [#allocation6], 1 }
 0x249   :  { %941 = vsyncpa [#allocation4], 1 }
 0x24a   :  { %943 = vsyncpa [#allocation4 + $0x1], 1 }
 0x24b   :  { %944 = vsyncpa [#allocation9], 1 }
 0x24c   :  { %946 = vsyncpa [#allocation9 + $0x1], 1 }

</bundles_post_ra>
